<compile_context>
chip_gen: v7x
topology: tpu7x:2x2x1
jax: 0.10.0
libtpu: 0.0.40
codegen_flags: <defaults>
</compile_context>

<pallas_src>
import math
import jax
import jax.numpy as jnp
from jax.experimental import pallas as pl
from jax.experimental.pallas import tpu as pltpu


def _round_up(x, m):
    return -(-x // m) * m


def _band_kernel(x_ref, w_ref, b_ref, o_ref):
    """One grid step = TF frequency bins of the band.

    x_ref : (TF, Bp, K2p)   [xr | xi] stacked on the contraction axis (bf16/f32)
    w_ref : (TF, K2p, N2p)  stacked weights -> [real | imag] outputs (bf16/f32)
    b_ref : (TF, 1,  N2p)   [br | bi] (f32, added post-MXU)
    o_ref : (TF, Bp, N2p)   fused [real | imag] output, lane-dense f32 store
    """
    acc = jnp.einsum('fbi,fio->fbo', x_ref[...], w_ref[...],
                     preferred_element_type=jnp.float32)
    o_ref[...] = (acc + b_ref[...]).astype(o_ref.dtype)


def _chip_config():
    """Per-generation block budget / VMEM limit / grid-split heuristics.

    block_budget is the TOTAL (double-buffer-inclusive) VMEM bytes allowed for
    one grid step's blocks; vmem_limit is passed to the compiler;
    min_grid_steps forces >=2 steps along NF only where there are 2 TensorCores
    to split them across (v7x).
    """
    try:
        kind = jax.devices()[0].device_kind.lower()
    except Exception:
        kind = ""
    if ("v5 lite" in kind) or ("v5e" in kind) or ("v5lite" in kind):
        # v5e: 1 TC, 128 MiB VMEM, ~0.82 TB/s HBM -> big blocks, no forced split.
        return dict(block_budget=28 << 20, vmem_limit=96 << 20, min_grid_steps=1)
    if "v6" in kind:
        # v6e: 1 TC, 128 MiB VMEM, ~1.4 TB/s HBM -> big blocks, no forced split.
        return dict(block_budget=28 << 20, vmem_limit=96 << 20, min_grid_steps=1)
    if "7" in kind:
        # v7x: 2 TCs, 64 MiB VMEM per TC -> keep a 2-way NF split, moderate blocks.
        return dict(block_budget=18 << 20, vmem_limit=44 << 20, min_grid_steps=2)
    # Unknown generation: conservative, assume possibly 2 cores.
    return dict(block_budget=16 << 20, vmem_limit=48 << 20, min_grid_steps=2)


def _choose_tf(nf, bytes_per_freq, budget_bytes, min_grid_steps):
    """Frequencies per grid step under a (double-buffer-inclusive) VMEM budget,
    chosen to minimize zero-padded waste on the last block."""
    max_tf = max(1, int(budget_bytes // max(bytes_per_freq, 1)))
    max_tf = min(max_tf, nf)
    if min_grid_steps > 1 and nf > 1:
        max_tf = min(max_tf, _round_up(nf, min_grid_steps) // min_grid_steps)
    max_tf = max(max_tf, 1)

    nblocks = -(-nf // max_tf)
    tf_even = -(-nf // nblocks)          # even split -> minimal last-block waste
    tf = tf_even
    if tf_even >= 8:
        tf_8 = min(_round_up(tf_even, 8), max_tf)

        def waste(t):
            return -(-nf // t) * t - nf

        if waste(tf_8) <= waste(tf_even):
            tf = tf_8                    # prefer mult-of-8 only if waste-neutral
    return int(tf)


def banded_complex_matmul(x_cat, w_full, b_full, tf, *,
                          vmem_limit_bytes, extra_weight_buffering=False):
    """Blocked per-frequency complex matmul (real-stacked form) on TPU."""
    nf_pad, bp, k2p = x_cat.shape
    n2p = w_full.shape[-1]
    assert nf_pad % tf == 0, (nf_pad, tf)
    grid = (nf_pad // tf,)

    w_spec_kwargs = {}
    if extra_weight_buffering:
        # Weights are the dominant stream; 3-deep pipelining hides exposed DMA.
        w_spec_kwargs["pipeline_mode"] = pl.Buffered(3)

    return pl.pallas_call(
        _band_kernel,
        grid=grid,
        in_specs=[
            pl.BlockSpec((tf, bp, k2p), lambda f: (f, 0, 0)),
            pl.BlockSpec((tf, k2p, n2p), lambda f: (f, 0, 0), **w_spec_kwargs),
            pl.BlockSpec((tf, 1, n2p), lambda f: (f, 0, 0)),
        ],
        out_specs=pl.BlockSpec((tf, bp, n2p), lambda f: (f, 0, 0)),
        out_shape=jax.ShapeDtypeStruct((nf_pad, bp, n2p), jnp.float32),
        compiler_params=pltpu.CompilerParams(
            dimension_semantics=("parallel",),   # NF axis -> split across TCs (v7x)
            vmem_limit_bytes=vmem_limit_bytes,
        ),
    )(x_cat, w_full, b_full)


class BandedFourierLayerPallas:
    """JAX/Pallas re-implementation of the PyTorch BandedFourierLayer forward
    (freq_mixing=False path)."""

    def __init__(self, in_channels, out_channels, band, num_bands,
                 bias=True, length=201, key=None,
                 compute_dtype=jnp.bfloat16,        # bf16 streaming by default
                 extra_weight_buffering=False):
        self.length = length
        self.total_freqs = length // 2 + 1
        self.in_channels = in_channels
        self.out_channels = out_channels
        self.band = band
        self.num_bands = num_bands
        self.num_freqs = (self.total_freqs // num_bands
                          + (self.total_freqs % num_bands
                             if band == num_bands - 1 else 0))
        self.start = band * (self.total_freqs // num_bands)
        self.end = self.start + self.num_freqs
        self.compute_dtype = jnp.dtype(compute_dtype)
        self.extra_weight_buffering = extra_weight_buffering
        self._cfg = _chip_config()

        if key is None:
            key = jax.random.PRNGKey(0)
        kwr, kwi, kbr, kbi = jax.random.split(key, 4)

        # Deterministic init mimicking kaiming_uniform_(a=sqrt(5)) on a
        # (num_freqs, Cin, Cout) tensor: fan_in = Cin * Cout (PyTorch rule for
        # rank-3 tensors), bound = 1/sqrt(fan_in).
        fan_in = in_channels * out_channels
        bound = 1.0 / math.sqrt(fan_in) if fan_in > 0 else 0.0
        wshape = (self.num_freqs, in_channels, out_channels)
        self.wr = jax.random.uniform(kwr, wshape, jnp.float32, -bound, bound)
        self.wi = jax.random.uniform(kwi, wshape, jnp.float32, -bound, bound)
        if bias:
            bshape = (self.num_freqs, 1, out_channels)
            self.br = jax.random.uniform(kbr, bshape, jnp.float32, -bound, bound)
            self.bi = jax.random.uniform(kbi, bshape, jnp.float32, -bound, bound)
        else:
            self.br = jnp.zeros((self.num_freqs, 1, out_channels), jnp.float32)
            self.bi = jnp.zeros((self.num_freqs, 1, out_channels), jnp.float32)

        # Lane-dense padded channel dims (multiple of 128 on both stacked axes).
        self.k2 = 2 * in_channels
        self.n2 = 2 * out_channels
        self.k2_pad = _round_up(self.k2, 128)
        self.n2_pad = _round_up(self.n2, 128)

        # Real-stacked weights / bias, zero-padded to lane-dense shapes:
        #   x_cat @ [wr; -wi] -> real,  x_cat @ [wi; wr] -> imag
        w_real = jnp.concatenate([self.wr, -self.wi], axis=1)   # (NF, 2Cin, Cout)
        w_imag = jnp.concatenate([self.wi, self.wr], axis=1)    # (NF, 2Cin, Cout)
        w_full = jnp.concatenate([w_real, w_imag], axis=2)      # (NF, 2Cin, 2Cout)
        b_full = jnp.concatenate([self.br, self.bi], axis=2)    # (NF, 1,    2Cout)
        w_full = jnp.pad(w_full, ((0, 0),
                                  (0, self.k2_pad - self.k2),
                                  (0, self.n2_pad - self.n2)))
        b_full = jnp.pad(b_full, ((0, 0), (0, 0), (0, self.n2_pad - self.n2)))
        self.w_full = w_full.astype(self.compute_dtype)   # streamed narrow
        self.b_full = b_full.astype(jnp.float32)          # added post-MXU in f32

    def __call__(self, x):
        # x: (B, T, Cin) float32
        b, t, _ = x.shape
        x_fft = jnp.fft.rfft(x, axis=1)                   # (B, F_total, Cin) c64
        band = x_fft[:, self.start:self.end, :]           # (B, NF, Cin)
        band_fm = jnp.transpose(band, (1, 0, 2))          # (NF, B, Cin)
        # frequency-major, real/imag stacked on the contraction axis
        x_cat = jnp.concatenate(
            [jnp.real(band_fm), jnp.imag(band_fm)], axis=-1)  # (NF, B, 2Cin) f32

        # ---- pad to TPU-friendly layout: sublane (B) and lane (2Cin) dims ----
        b_mult = 16 if self.compute_dtype.itemsize == 2 else 8
        b_pad = _round_up(b, b_mult)
        x_cat = jnp.pad(x_cat, ((0, 0),
                                (0, b_pad - b),
                                (0, self.k2_pad - self.k2)))
        x_cat = x_cat.astype(self.compute_dtype)

        # ---- size TF from the RUNTIME batch, double-buffering accounted ------
        itemsize = self.compute_dtype.itemsize
        w_bufs = 3 if self.extra_weight_buffering else 2
        bytes_per_freq = (
            2 * b_pad * self.k2_pad * itemsize               # x block, 2 buffers
            + w_bufs * self.k2_pad * self.n2_pad * itemsize  # w block
            + 2 * b_pad * self.n2_pad * 4                    # out block (f32)
            + 2 * 1 * self.n2_pad * 4)                       # bias block (f32)
        tf = _choose_tf(self.num_freqs, bytes_per_freq,
                        self._cfg["block_budget"], self._cfg["min_grid_steps"])
        nf_pad = _round_up(self.num_freqs, tf)

        pad_f = nf_pad - self.num_freqs
        w_full, b_full = self.w_full, self.b_full
        if pad_f:
            x_cat = jnp.pad(x_cat, ((0, pad_f), (0, 0), (0, 0)))
            w_full = jnp.pad(w_full, ((0, pad_f), (0, 0), (0, 0)))
            b_full = jnp.pad(b_full, ((0, pad_f), (0, 0), (0, 0)))

        out_full = banded_complex_matmul(
            x_cat, w_full, b_full, tf,
            vmem_limit_bytes=self._cfg["vmem_limit"],
            extra_weight_buffering=self.extra_weight_buffering,
        )                                                  # (NFp, Bp, N2p) f32

        out_full = out_full[:self.num_freqs, :b, :]
        out_band = (out_full[..., :self.out_channels]
                    + 1j * out_full[..., self.out_channels:self.n2]
                    ).astype(jnp.complex64)
        out_band = jnp.transpose(out_band, (1, 0, 2))      # (B, NF, Cout)

        out_fft = jnp.zeros((b, t // 2 + 1, self.out_channels), jnp.complex64)
        out_fft = out_fft.at[:, self.start:self.end, :].set(out_band)
        return jnp.fft.irfft(out_fft, n=t, axis=1)         # (B, T, Cout) f32

    # pure-JAX reference for correctness checking
    def reference(self, x):
        b, t, _ = x.shape
        x_fft = jnp.fft.rfft(x, axis=1)
        band = x_fft[:, self.start:self.end, :]
        w = (self.wr + 1j * self.wi).astype(jnp.complex64)
        bias = (self.br[:, 0, :] + 1j * self.bi[:, 0, :]).astype(jnp.complex64)
        out_band = jnp.einsum('bti,tio->bto', band, w) + bias[None]
        out_fft = jnp.zeros((b, t // 2 + 1, self.out_channels), jnp.complex64)
        out_fft = out_fft.at[:, self.start:self.end, :].set(out_band)
        return jnp.fft.irfft(out_fft, n=t, axis=1)


if __name__ == "__main__":
    key = jax.random.PRNGKey(0)
    kx, kp = jax.random.split(key)

    B, T, CIN, COUT = 2, 16, 4, 8
    x = jax.random.normal(kx, (B, T, CIN), dtype=jnp.float32)

    # f32 compute path: tight check against the pure-JAX reference.
    layer_f32 = BandedFourierLayerPallas(CIN, COUT, band=0, num_bands=2,
                                         bias=True, length=T, key=kp,
                                         compute_dtype=jnp.float32)
    out_f32 = jax.block_until_ready(layer_f32(x))
    ref = jax.block_until_ready(layer_f32.reference(x))
    assert out_f32.shape == (B, T, COUT)
    assert jnp.allclose(out_f32, ref, atol=1e-4, rtol=1e-4), "f32 mismatch vs reference"

    # default bf16-streaming path (perf config): looser tolerance (bf16 inputs).
    layer_bf16 = BandedFourierLayerPallas(CIN, COUT, band=0, num_bands=2,
                                          bias=True, length=T, key=kp)
    out_bf16 = jax.block_until_ready(layer_bf16(x))
    assert out_bf16.shape == (B, T, COUT)
    assert jnp.allclose(out_bf16, ref, atol=5e-2, rtol=5e-2), "bf16 mismatch vs reference"

    print("KERNEL_OK")
</pallas_src>

<mosaic_0001>
module attributes {stable_mosaic.version = 11 : i64} {
  func.func @_band_kernel(%arg0: i32, %arg1: memref<2x8x128xf32, #tpu.memory_space<vmem>>, %arg2: memref<2x128x128xf32, #tpu.memory_space<vmem>>, %arg3: memref<2x1x128xf32, #tpu.memory_space<vmem>>, %arg4: memref<2x8x128xf32, #tpu.memory_space<vmem>>) attributes {dimension_semantics = [#tpu.dimension_semantics<parallel>], iteration_bounds = array<i64: 2>, scalar_prefetch = 0 : i64, scratch_operands = 0 : i64, tpu.core_type = #tpu.core_type<tc>, window_params = [{transform_indices = @transform_0, window_bounds = array<i64: 2, 8, 128>}, {transform_indices = @transform_1, window_bounds = array<i64: 2, 128, 128>}, {transform_indices = @transform_2, window_bounds = array<i64: 2, 1, 128>}, {transform_indices = @transform_3, window_bounds = array<i64: 2, 8, 128>}]} {
    %c0 = arith.constant 0 : index
    %c0_0 = arith.constant 0 : index
    %c0_1 = arith.constant 0 : index
    %0 = vector.load %arg1[%c0, %c0_0, %c0_1] : memref<2x8x128xf32, #tpu.memory_space<vmem>>, vector<2x8x128xf32>
    %c0_2 = arith.constant 0 : index
    %c0_3 = arith.constant 0 : index
    %c0_4 = arith.constant 0 : index
    %1 = vector.load %arg2[%c0_2, %c0_3, %c0_4] : memref<2x128x128xf32, #tpu.memory_space<vmem>>, vector<2x128x128xf32>
    "tpu.trace_start"() <{level = 10 : i32, message = "fbi,fio->fbo"}> : () -> ()
    %cst = arith.constant dense<0.000000e+00> : vector<2x8x128xf32>
    %2 = tpu.matmul %0, %1, %cst {dimension_numbers = #tpu.dot_dimension_numbers<[2], [1], [1], [2], [0, 0, 0, 1, 1, 2], [0], [0]>} : vector<2x8x128xf32>, vector<2x128x128xf32>, vector<2x8x128xf32> -> vector<2x8x128xf32>
    "tpu.trace_stop"() : () -> ()
    %c0_5 = arith.constant 0 : index
    %c0_6 = arith.constant 0 : index
    %c0_7 = arith.constant 0 : index
    %3 = vector.load %arg3[%c0_5, %c0_6, %c0_7] : memref<2x1x128xf32, #tpu.memory_space<vmem>>, vector<2x1x128xf32>
    %4 = vector.broadcast %3 : vector<2x1x128xf32> to vector<2x8x128xf32>
    %5 = arith.addf %2, %4 : vector<2x8x128xf32>
    %c0_8 = arith.constant 0 : index
    %c0_9 = arith.constant 0 : index
    %c0_10 = arith.constant 0 : index
    %6 = vector.load %arg4[%c0_8, %c0_9, %c0_10] : memref<2x8x128xf32, #tpu.memory_space<vmem>>, vector<2x8x128xf32>
    tpu.vector_store %arg4[%c0_8, %c0_9, %c0_10], %5 {strides = array<i32>} : memref<2x8x128xf32, #tpu.memory_space<vmem>>, vector<2x8x128xf32>,
    return
  }
  func.func @transform_0(%arg0: i32) -> (i32, i32, i32) {
    %c0_i32 = arith.constant 0 : i32
    %c0_i32_0 = arith.constant 0 : i32
    %c0_i32_1 = arith.constant 0 : i32
    return %arg0, %c0_i32, %c0_i32_0 : i32, i32, i32
  }
  func.func @transform_1(%arg0: i32) -> (i32, i32, i32) {
    %c0_i32 = arith.constant 0 : i32
    %c0_i32_0 = arith.constant 0 : i32
    %c0_i32_1 = arith.constant 0 : i32
    return %arg0, %c0_i32, %c0_i32_0 : i32, i32, i32
  }
  func.func @transform_2(%arg0: i32) -> (i32, i32, i32) {
    %c0_i32 = arith.constant 0 : i32
    %c0_i32_0 = arith.constant 0 : i32
    %c0_i32_1 = arith.constant 0 : i32
    return %arg0, %c0_i32, %c0_i32_0 : i32, i32, i32
  }
  func.func @transform_3(%arg0: i32) -> (i32, i32, i32) {
    %c0_i32 = arith.constant 0 : i32
    %c0_i32_0 = arith.constant 0 : i32
    %c0_i32_1 = arith.constant 0 : i32
    return %arg0, %c0_i32, %c0_i32_0 : i32, i32, i32
  }
}

</mosaic_0001>

<bundles_post_ra>
// kernel: tpu_custom_call.1
= control target key start
LH: loop header
LB: loop body
LE: loop exit
PB: predicated region body
PF: predicated region fallthrough
CT: control target
= control target key end

     0   :  { %8 = vsyncpa [#allocation3], 0  ;;  %s1239_s0 = inlined_call_operand.hbm [shape: f32[4,8,128], index: 0, kind: input, shape index: {}]   ;;  %s1240_s1 = inlined_call_operand.hbm [shape: f32[4,128,128], index: 1, kind: input, shape index: {}]   ;;  %s1241_s2 = inlined_call_operand.vmem [shape: f32[4,1,128], index: 2, kind: input, shape index: {}]   ;;  %s1242_s3 = inlined_call_operand.hbm [shape: f32[4,8,128], index: 3, kind: output, shape index: {}]  }
   0x1   :  { %10 = vsyncpa [#allocation3 + $0x1], 0 }
   0x2   :  { %11 = vsyncpa [#allocation6], 0 }
   0x3   :  { %13 = vsyncpa [#allocation6 + $0x1], 0 }
   0x4   :  { %14 = vsyncpa [#allocation4], 0 }
   0x5   :  { %16 = vsyncpa [#allocation4 + $0x1], 0  ;;  %s959_s12 = smov 0   ;;  %s961_s13 = smov 0  }
   0x6   :  { %s963_s14 = smov 0   ;;  %s965_s15 = smov 0  }
   0x7 LB: > { %s980_s16 = sadd.s32 4294967295, %s927_s15   ;;  %s561_s17 = sadd.s32 4294967294, %s927_s15   ;;  %s927_s15 = sphi %s965_s15, %s1258_s15   ;;  %s923_s14 = sphi %s963_s14, %s1257_s14   ;;  %s919_s13 = sphi %s961_s13, %s1256_s13   ;;  %s915_s12 = sphi %s959_s12, %s1255_s12  }
   0x8   : > { %s984_s18 = sadd.s32 1, %s927_s15   ;;  %s29_s19 = sadd.s32 1, %s923_s14 }
   0x9   : > { %s26_s20 = ssub.s32 %s927_s15, %s984_s18  ;;  %p36_p0 = scmp.ne.s32.totalorder %s923_s14, %s919_s13 }
   0xa   : > { %p27_p1 = scmp.eq.s32.totalorder %s26_s20, 0  ;;  %p37_p2 = scmp.eq.s32.totalorder %s927_s15, 0 }
   0xb   : > { %p42_p3 = scmp.ne.s32.totalorder %s919_s13, %s915_s12  ;;  %p43_p4 = scmp.eq.s32.totalorder %s980_s16, 0 }
   0xc   : > { %s996_s21 = scalar_select %p27_p1, %s923_s14, %s29_s19  }
   0xd   : > { %p998_p5 = por %p37_p2, %p36_p0  ;;  %p1002_p6 = por %p43_p4, %p42_p3 }
   0xe   : > { %p118_p7 = scmp.eq.s32.totalorder %s980_s16, 1  ;;  %p124_p8 = scmp.eq.s32.totalorder %s561_s17, 1 }
   0xf   : > { %s1246_s23 = scalar_select %p1002_p6, 1, 0 }
  0x10   : > { %p756_p10 = scmp.lt.s32.totalorder %s927_s15, 2  ;;  %p1009_p11 = por %p118_p7, %p36_p0 }
  0x11   : > { %p1013_p12 = por %p124_p8, %p42_p3  ;;  %s1018_s26 = sand.u32 1, %s923_s14  }
  0x12   : > { %s1247_s24 = scalar_select %p1009_p11, 1, 0 }
  0x13   : > { %s1248_s25 = scalar_select %p1013_p12, 1, 0 }
  0x14   : > { %s583_s27 = sshll.u32 %s927_s15, 8  ;;  %s564_s28 = sshll.u32 %s1018_s26, 4 }
  0x15   : > { %s1025_s4 = scalar_lea.hbm %s1239_s0, %s583_s27  ;;  %s148_s5 = scalar_lea.vmem [#allocation2], %s564_s28 }
  0x16   : > { %s155_s6 = sshll.u32 %s148_s5, 4  ;;  %p1029_p13 = pnand %p756_p10, %p998_p5  ;;  %s1033_s6 = int_to_ptr.vmem [resolvable:$true] %s155_s6 }
  0x17   : > { %s145_s8 = scalar_lea.sflag [#allocation3], %s1018_s26  ;;  %s797_s9 = scalar_lea.hbm %s1025_s4, 256 }
  0x18   : > { %p798_p0 = scmp.ne.s32.totalorder %s1025_s4, %s797_s9  ;;  %p799_p1 = pneg %p1029_p13 }
  0x19   : > { %s802_s17 = scalar_lea.hbm %s1239_s0, 512  ;;  %p803_p4 = scmp.lt.u32.totalorder %s1025_s4, %s1239_s0 }
  0x1a   : > { %p800_p2 = pnand %p799_p1, %p798_p0  ;;  %p804_p5 = scmp.lt.u32.totalorder %s802_s17, %s797_s9 }
  0x1b   : > { %p806_p8 = scmp.lt.u32.totalorder %s797_s9, %s1025_s4 }
  0x1c   : > { %p801_p3 = pneg %p800_p2  ;;  %p805_p7 = por %p804_p5, %p803_p4 }
  0x1e   : > { %p807_p10 = por %p806_p8, %p805_p7 }
  0x20   : > { %p808_p9 = pnand %p807_p10, %p801_p3 }
  0x22   : > { %811 = shalt.err (!%p808_p9)
}
  0x23   : > { %s812_s22 = scalar_lea.vmem %s1033_s6, 256  ;;  %s929_s27 = smov [#allocation2]  }
  0x24   : > { %p813_p0 = scmp.ne.s32.totalorder %s1033_s6, %s812_s22  ;;  %s817_s28 = sshll.u32 %s929_s27, 4  ;;  %s818_s28 = int_to_ptr.vmem [resolvable:$false] %s817_s28 }
  0x25   : > { %s819_s29 = scalar_lea.vmem %s818_s28, 512  ;;  %p820_p11 = scmp.lt.s32.totalorder %s1033_s6, %s818_s28 }
  0x26   : > { %p815_p2 = pnand %p813_p0, %p799_p1  ;;  %p821_p4 = scmp.lt.s32.totalorder %s819_s29, %s812_s22 }
  0x28   : > { %p816_p12 = pneg %p815_p2  ;;  %p822_p5 = por %p821_p4, %p820_p11 }
  0x2a   : > { %p823_p7 = pnand %p822_p5, %p816_p12 }
  0x2c   : > { %826 = shalt.err (!%p823_p7)
}
  0x2d   : > { %s930_s30 = smov 128   ;;  %s931_s5 = smov 8  }
  0x2e   : > { %748 = dma.hbm_to_vmem [thread:$0]  (!%p1029_p13), %s1025_s4, 256, %s1033_s6, %s145_s8, %s930_s30, %s930_s30, %s931_s5  }
  0x2f   : > { %p571_p9 = scmp.ge.s32.totalorder %s927_s15, 1  ;;  %p193_p11 = scmp.lt.s32.totalorder %s927_s15, 3 }
  0x30   : > { %s567_s9 = sshll.u32 %s1018_s26, 8  ;;  %s585_s11 = sshll.u32 %s927_s15, 12 }
  0x31   : > { %p1069_p12 = pnand %p571_p9, %p193_p11  ;;  %s169_s17 = scalar_lea.vmem [#allocation5], %s567_s9 }
  0x32   : > { %s177_s19 = sshll.u32 %s169_s17, 4  ;;  %s1077_s27 = scalar_lea.hbm %s1240_s1, %s585_s11  ;;  %s1079_s19 = int_to_ptr.vmem [resolvable:$true] %s177_s19 }
  0x33   : > { %s166_s4 = scalar_lea.sflag [#allocation6], %s1018_s26  ;;  %s827_s6 = scalar_lea.hbm %s1077_s27, 4096 }
  0x34   : > { %p828_p3 = scmp.ne.s32.totalorder %s1077_s27, %s827_s6  ;;  %s832_s29 = scalar_lea.hbm %s1240_s1, 8192 }
  0x35   : > { %p833_p0 = scmp.lt.u32.totalorder %s1077_s27, %s1240_s1  ;;  %p834_p2 = scmp.lt.u32.totalorder %s832_s29, %s827_s6 }
  0x36   : > { %p830_p8 = pnand %p828_p3, %p799_p1  ;;  %p836_p5 = scmp.lt.u32.totalorder %s827_s6, %s1077_s27 }
  0x37   : > { %p835_p4 = por %p834_p2, %p833_p0 }
  0x38   : > { %p831_p10 = pneg %p830_p8 }
  0x39   : > { %p837_p7 = por %p836_p5, %p835_p4 }
  0x3b   : > { %p838_p9 = pnand %p837_p7, %p831_p10 }
  0x3d   : > { %841 = shalt.err (!%p838_p9)
}
  0x3e   : > { %s842_s17 = scalar_lea.vmem %s1079_s19, 4096  ;;  %s932_s20 = smov [#allocation5]  }
  0x3f   : > { %p843_p11 = scmp.ne.s32.totalorder %s1079_s19, %s842_s17  ;;  %s847_s22 = sshll.u32 %s932_s20, 4  ;;  %s848_s22 = int_to_ptr.vmem [resolvable:$false] %s847_s22 }
  0x40   : > { %s849_s8 = scalar_lea.vmem %s848_s22, 8192  ;;  %p850_p6 = scmp.lt.s32.totalorder %s1079_s19, %s848_s22 }
  0x41   : > { %p845_p3 = pnand %p843_p11, %p799_p1  ;;  %p851_p0 = scmp.lt.s32.totalorder %s849_s8, %s842_s17 }
  0x43   : > { %p846_p8 = pneg %p845_p3  ;;  %p852_p2 = por %p851_p0, %p850_p6 }
  0x45   : > { %p853_p4 = pnand %p852_p2, %p846_p8 }
  0x47   : > { %856 = shalt.err (!%p853_p4)
}
  0x48   : > { %751 = dma.hbm_to_vmem [thread:$0]  (!%p1029_p13), %s1077_s27, 4096, %s1079_s19, %s166_s4, %s930_s30, %s930_s30, %s931_s5  }
  0x49   : > { %197 = sbr.rel (%p1069_p12) target bundleno = 348 (0x15c), region = 32  ;;  %s1113_s6 = sand.u32 (!%p1069_p12), 1, %s919_s13  }
  0x4a   : > { %s572_s28 = sshll.u32 (!%p1069_p12), %s1113_s6, 4  ;;  %s200_s7 = scalar_lea.sflag (!%p1069_p12), [#allocation3], %s1113_s6 }
  0x4b   : > { %s1119_s29 = scalar_lea.vmem (!%p1069_p12), [#allocation2], %s572_s28  ;;  %p1251_p6 = scmp.ne.s32.totalorder (!%p1069_p12), %s1246_s23, 0 }
  0x50   : > { %902 = dma.done.wait (%p1251_p6), %s200_s7, 256  }
  0x51   : > { %904 = vsyncadd (%p1251_p6), %s200_s7, 4294967040  ;;  %s573_s26 = sshll.u32 %s1113_s6, 8  ;;  %s209_s30 = scalar_lea.sflag [#allocation6], %s1113_s6 }
  0x52   : > { %s1127_s5 = scalar_lea.vmem [#allocation5], %s573_s26 }
  0x53   : > { %906 = dma.done.wait (%p1251_p6), %s209_s30, 4096  }
  0x54   : > { %908 = vsyncadd (%p1251_p6), %s209_s30, 4294963200  ;;  %v933_v0 = vmov 0.0|0.0   ;;  %vm934_vm0 = vmmov 0   ;;  %v935_v1 = vmov 0.0   ;;  %v254_v2 = vld [vmem:[%s1127_s5] sm:$0xff]  ;;  %v255_v3 = vld [vmem:[%s1127_s5 + $0x8] sm:$0xff] }
  0x55   : > { %691 = vmatprep.subr.bf16.mxu0 %v933_v0  ;;  %715 = vmatprep.subr.bf16.mxu1 %v933_v0  ;;  %v270_v4 = vld [vmem:[%s1127_s5 + $0x80] sm:$0xff]  ;;  %v692_v5 = vpack.c.bf16 %v255_v3, %v254_v2  ;;  %v271_v6 = vld [vmem:[%s1127_s5 + $0x88] sm:$0xff]  ;;  %v256_v7 = vld [vmem:[%s1127_s5 + $0x10] sm:$0xff]  ;;  %s575_s23 = sshll.u32 %s980_s16, 1  ;;  %s243_s4 = scalar_lea.vmem [#allocation7], %s572_s28 }
  0x56   : > { %653 = vmatprep.mubr.msk.f32.mxu0 %vm934_vm0, %v935_v1  ;;  %688 = vmatprep.mubr.msk.f32.mxu1 %vm934_vm0, %v935_v1  ;;  %v257_v8 = vld [vmem:[%s1127_s5 + $0x18] sm:$0xff]  ;;  %v716_v9 = vpack.c.bf16 %v271_v6, %v270_v4  ;;  %v272_v10 = vld [vmem:[%s1127_s5 + $0x90] sm:$0xff]  ;;  %v258_v14 = vld [vmem:[%s1127_s5 + $0x20] sm:$0xff]  ;;  %p247_p13 = scmp.lt.s32.totalorder %s575_s23, 3  ;;  %s456_s9 = sshll.u32 %s243_s4, 4  ;;  %s1190_s9 = int_to_ptr.vmem [resolvable:$true] %s456_s9 }
  0x57   : > { %v273_v11 = vld [vmem:[%s1127_s5 + $0x98] sm:$0xff]  ;;  %693 = vmatpush3.bf16.msra.mxu0 %v692_v5  ;;  %v695_v12 = vpack.c.bf16 %v257_v8, %v256_v7  ;;  %v259_v15 = vld [vmem:[%s1127_s5 + $0x28] sm:$0xff]  ;;  %v274_v16 = vld [vmem:[%s1127_s5 + $0xa0] sm:$0xff]  ;;  %s586_s11 = sshll.u32 %s980_s16, 8  ;;  %s443_s16 = scalar_lea.sflag [#allocation4], %s1113_s6 }
  0x58   : > { %717 = vmatpush3.bf16.msra.mxu1 %v716_v9  ;;  %694 = vmatprep.subr.bf16.mxu0 %v933_v0  ;;  %v719_v13 = vpack.c.bf16 %v273_v11, %v272_v10  ;;  %v275_v17 = vld [vmem:[%s1127_s5 + $0xa8] sm:$0xff]  ;;  %v698_v18 = vpack.c.bf16 %v259_v15, %v258_v14  ;;  %v260_v20 = vld [vmem:[%s1127_s5 + $0x30] sm:$0xff]  ;;  %v261_v21 = vld [vmem:[%s1127_s5 + $0x38] sm:$0xff]  ;;  %s1260_s23 = smov (!%p247_p13, %s575_s23), 3  ;;  %s1195_s22 = scalar_lea.hbm %s1242_s3, %s586_s11 }
  0x59   : > { %718 = vmatprep.subr.bf16.mxu1 %v933_v0  ;;  %v722_v19 = vpack.c.bf16 %v275_v17, %v274_v16  ;;  %v276_v22 = vld [vmem:[%s1127_s5 + $0xb0] sm:$0xff]  ;;  %v277_v23 = vld [vmem:[%s1127_s5 + $0xb8] sm:$0xff]  ;;  %v701_v24 = vpack.c.bf16 %v261_v21, %v260_v20  ;;  %v262_v26 = vld [vmem:[%s1127_s5 + $0x40] sm:$0xff]  ;;  %s249_s27 = scalar_lea.vmem %s1241_s2, %s1260_s23  ;;  %s857_s8 = scalar_lea.vmem %s1190_s9, 256 }
  0x5a   : > { %v725_v25 = vpack.c.bf16 %v277_v23, %v276_v22  ;;  %v263_v27 = vld [vmem:[%s1127_s5 + $0x48] sm:$0xff]  ;;  %v278_v28 = vld [vmem:[%s1127_s5 + $0xc0] sm:$0xff]  ;;  %v264_v32 = vld [vmem:[%s1127_s5 + $0x50] sm:$0xff]  ;;  %p858_p1 = scmp.ne.s32.totalorder %s1190_s9, %s857_s8  ;;  %p1252_p12 = scmp.ne.s32.totalorder %s1247_s24, 0 }
  0x5b   : > { %696 = vmatpush3.bf16.msra.mxu0 %v695_v12  ;;  %v279_v29 = vld [vmem:[%s1127_s5 + $0xc8] sm:$0xff]  ;;  %v704_v30 = vpack.c.bf16 %v263_v27, %v262_v26  ;;  %v265_v33 = vld [vmem:[%s1127_s5 + $0x58] sm:$0xff]  ;;  %v280_v34 = vld [vmem:[%s1127_s5 + $0xd0] sm:$0xff]  ;;  %s936_s28 = smov [#allocation7]  }
  0x5c   : > { %720 = vmatpush3.bf16.msra.mxu1 %v719_v13  ;;  %697 = vmatprep.subr.bf16.mxu0 %v933_v0  ;;  %v728_v31 = vpack.c.bf16 %v279_v29, %v278_v28  ;;  %v281_v35 = vld [vmem:[%s1127_s5 + $0xd8] sm:$0xff]  ;;  %v707_v36 = vpack.c.bf16 %v265_v33, %v264_v32  ;;  %v266_v38 = vld [vmem:[%s1127_s5 + $0x60] sm:$0xff]  ;;  %v267_v39 = vld [vmem:[%s1127_s5 + $0x68] sm:$0xff]  ;;  %p859_p10 = pnand %p858_p1, %p1252_p12  ;;  %s861_s7 = sshll.u32 %s936_s28, 4  ;;  %s862_s7 = int_to_ptr.vmem [resolvable:$false] %s861_s7 }
  0x5d   : > { %721 = vmatprep.subr.bf16.mxu1 %v933_v0  ;;  %v731_v37 = vpack.c.bf16 %v281_v35, %v280_v34  ;;  %v282_v40 = vld [vmem:[%s1127_s5 + $0xe0] sm:$0xff]  ;;  %v283_v41 = vld [vmem:[%s1127_s5 + $0xe8] sm:$0xff]  ;;  %v710_v42 = vpack.c.bf16 %v267_v39, %v266_v38  ;;  %v268_v44 = vld [vmem:[%s1127_s5 + $0x70] sm:$0xff]  ;;  %p864_p7 = scmp.lt.s32.totalorder %s1190_s9, %s862_s7 }
  0x5e   : > { %v734_v43 = vpack.c.bf16 %v283_v41, %v282_v40  ;;  %v269_v45 = vld [vmem:[%s1127_s5 + $0x78] sm:$0xff]  ;;  %v284_v46 = vld [vmem:[%s1127_s5 + $0xf0] sm:$0xff]  ;;  %v576_v52 = vld [vmem:[%s249_s27] ss:$0 sm:$0xff]  ;;  %p860_p5 = pneg %p859_p10 }
  0x5f   : > { %699 = vmatpush3.bf16.msra.mxu0 %v698_v18  ;;  %v285_v47 = vld [vmem:[%s1127_s5 + $0xf8] sm:$0xff]  ;;  %v713_v48 = vpack.c.bf16 %v269_v45, %v268_v44  ;;  %v252_v50 = vld [vmem:[%s1119_s29] sm:$0xff] }
  0x60   : > { %723 = vmatpush3.bf16.msra.mxu1 %v722_v19  ;;  %700 = vmatprep.subr.bf16.mxu0 %v933_v0  ;;  %v737_v49 = vpack.c.bf16 %v285_v47, %v284_v46  ;;  %v253_v51 = vld [vmem:[%s1119_s29 + $0x8] sm:$0xff]  ;;  %v577_v53 = vld [vmem:[%s249_s27 + $0x1] ss:$0 sm:$0xff]  ;;  %s863_s29 = scalar_lea.vmem %s862_s7, 512 }
  0x61   : > { %724 = vmatprep.subr.bf16.mxu1 %v933_v0  ;;  %p865_p9 = scmp.lt.s32.totalorder %s863_s29, %s857_s8 }
  0x63   : > { %702 = vmatpush3.bf16.msra.mxu0 %v701_v24  ;;  %p866_p11 = por %p865_p9, %p864_p7 }
  0x64   : > { %726 = vmatpush3.bf16.msra.mxu1 %v725_v25  ;;  %703 = vmatprep.subr.bf16.mxu0 %v933_v0 }
  0x65   : > { %727 = vmatprep.subr.bf16.mxu1 %v933_v0  ;;  %p867_p3 = pnand %p866_p11, %p860_p5 }
  0x67   : > { %705 = vmatpush3.bf16.msra.mxu0 %v704_v30 }
  0x68   : > { %729 = vmatpush3.bf16.msra.mxu1 %v728_v31  ;;  %706 = vmatprep.subr.bf16.mxu0 %v933_v0 }
  0x69   : > { %730 = vmatprep.subr.bf16.mxu1 %v933_v0 }
  0x6b   : > { %708 = vmatpush3.bf16.msra.mxu0 %v707_v36 }
  0x6c   : > { %732 = vmatpush3.bf16.msra.mxu1 %v731_v37  ;;  %709 = vmatprep.subr.bf16.mxu0 %v933_v0 }
  0x6d   : > { %733 = vmatprep.subr.bf16.mxu1 %v933_v0 }
  0x6f   : > { %711 = vmatpush3.bf16.msra.mxu0 %v710_v42 }
  0x70   : > { %735 = vmatpush3.bf16.msra.mxu1 %v734_v43  ;;  %712 = vmatprep.subr.bf16.mxu0 %v933_v0 }
  0x71   : > { %736 = vmatprep.subr.bf16.mxu1 %v933_v0 }
  0x73   : > { %714 = vmatpush3.bf16.msra.mxu0 %v713_v48 }
  0x74   : > { %738 = vmatpush3.bf16.msra.mxu1 %v737_v49 }
  0x76   : > { %654 = vmatmul.mubr.f32.vlgmr.msra.gmra.mrb[0].mxu0 %v252_v50 }
  0x77   : > { %689 = vmatmul.mubr.f32.vlgmr.msra.gmra.mrb[0].mxu1 %v253_v51 }
 0x149   : > { %v366_v54 = vpop.f32.mrb[0].mxu0 }
 0x14a   : > { %v367_v55 = vadd.f32 %v576_v52, %v366_v54  ;;  %v436_v56 = vpop.f32.mrb[0].mxu1  ;;  %v655_v57 = vpop.f32.mrb[1].mxu0 }
 0x14b   : > { %v437_v58 = vadd.f32 %v577_v53, %v436_v56  ;;  %v690_v59 = vpop.f32.mrb[1].mxu1 }
 0x14c   : > { %440 = vst [vmem:[%s243_s4] sm:$0xff] %v367_v55 }
 0x14d   : > { %441 = vst [vmem:[%s243_s4 + $0x8] sm:$0xff] %v437_v58 }
 0x14e   : > { %870 = shalt.err (!%p867_p3)
}
 0x14f   : > { %s871_s26 = scalar_lea.hbm %s1195_s22, 256  ;;  %s875_s23 = scalar_lea.hbm %s1242_s3, 512 }
 0x150   : > { %p872_p8 = scmp.ne.s32.totalorder %s1195_s22, %s871_s26  ;;  %p876_p4 = scmp.lt.u32.totalorder %s1195_s22, %s1242_s3 }
 0x151   : > { %p877_p6 = scmp.lt.u32.totalorder %s875_s23, %s871_s26  ;;  %p879_p1 = scmp.lt.u32.totalorder %s871_s26, %s1195_s22 }
 0x152   : > { %p873_p0 = pnand %p872_p8, %p1252_p12 }
 0x153   : > { %p878_p13 = por %p877_p6, %p876_p4 }
 0x154   : > { %p874_p2 = pneg %p873_p0 }
 0x155   : > { %p880_p10 = por %p879_p1, %p878_p13 }
 0x157   : > { %p881_p5 = pnand %p880_p10, %p874_p2 }
 0x159   : > { %884 = shalt.err (!%p881_p5)
}
 0x15a   : > { %s937_s27 = smov 128   ;;  %s938_s4 = smov 8  }
 0x15b   : > { %743 = dma.vmem_to_hbm [thread:$0]  (%p1252_p12), %s1190_s9, 256, %s1195_s22, %s443_s16, %s937_s27, %s937_s27, %s938_s4  }
 0x15c PF: > { %s471_s11 = sand.u32 1, %s915_s12   ;;  %p1253_p7 = scmp.ne.s32.totalorder %s1248_s25, 0 }
 0x15d   : > { %p1254_p9 = scmp.ge.s32.totalorder %s927_s15, 2  ;;  %s472_s17 = scalar_lea.sflag [#allocation4], %s471_s11 }
 0x15f   : > { %p753_p11 = pnand %p1254_p9, %p1253_p7 }
 0x161   : > { %910 = dma.done.wait (!%p753_p11), %s472_s17, 256  }
 0x162   : > { %912 = vsyncadd (!%p753_p11), %s472_s17, 4294967040  ;;  %p19_p3 = scmp.ge.s32.totalorder %s984_s18, 4   ;;  %s1255_s12 = smov %s919_s13 }
 0x163   : > { %s1256_s13 = smov %s923_s14  ;;  %s1257_s14 = smov %s996_s21 }
 0x164   : > { %s1258_s15 = smov %s984_s18  ;;  %21 = sbr.rel (!%p19_p3) target bundleno = 7 (0x7), region = 93 }
 0x16b   :  { %477 = vsyncpa [#allocation3], 1 }
 0x16c   :  { %479 = vsyncpa [#allocation3 + $0x1], 1 }
 0x16d   :  { %480 = vsyncpa [#allocation6], 1 }
 0x16e   :  { %482 = vsyncpa [#allocation6 + $0x1], 1 }
 0x16f   :  { %483 = vsyncpa [#allocation4], 1 }
 0x170   :  { %485 = vsyncpa [#allocation4 + $0x1], 1 }

</bundles_post_ra>
